<compile_context>
chip_gen: v7x
topology: tpu7x:2x2x1
jax: 0.10.0
libtpu: 0.0.40
codegen_flags: <defaults>
</compile_context>

<pallas_src>
import math

import jax
import jax.numpy as jnp
from jax.experimental import pallas as pl
from jax.experimental.pallas import tpu as pltpu


# ---------------------------------------------------------------------------
# Model dimensions
# ---------------------------------------------------------------------------
BATCH = 512            # batch sits on the lane axis -> keep it a few x 128
OBS_DIM = 32
OBS_QB_DIM = 16
HIDDEN_DIM = 32
HID_QB_DIM = 16
NUM_ACTIONS = 8

FEAT_PAD = 32          # all per-layer [out, in] tiles are zero-padded to 32x32
N_LAYERS = 6           # oe, od, p1, he, hd, p2
BATCH_BLOCK = 256      # lane-dense batch block per grid step


# ---------------------------------------------------------------------------
# Ternary quantizer
# ---------------------------------------------------------------------------
def _ternary_threshold():
    # a(e) = 1.5*tanh(e) + 0.5*tanh(-3e) = 4 t^3 / (1 + 3 t^2) with t = tanh(e),
    # which is monotone in e.  a(e) = 0.5  <=>  8 t^3 - 3 t^2 - 1 = 0.
    t = 0.7
    for _ in range(60):
        f = 8.0 * t ** 3 - 3.0 * t ** 2 - 1.0
        fp = 24.0 * t ** 2 - 6.0 * t
        t = t - f / fp
    return math.atanh(t)


_QUANT_T = _ternary_threshold()   # ~0.79468


def _ternary_quantize_from_preact(e):
    """Forward-equivalent to snapping 1.5*tanh(e)+0.5*tanh(-3e) at +/-0.5.

    Saves 2 EUP tanh evaluations per QBN (EUP is the first unit to saturate
    here).  Values exactly on the boundary are measure-zero.
    """
    return jnp.where(e > _QUANT_T, 1.0, jnp.where(e < -_QUANT_T, -1.0, 0.0))


def _ternary_tanh_quantize(e):
    """Original two-tanh QBN quantizer (used by the pure-JAX reference)."""
    a = 1.5 * jnp.tanh(e) + 0.5 * jnp.tanh(-3.0 * e)
    return jnp.where(a > 0.5, 1.0, jnp.where(a < -0.5, -1.0, 0.0))


# ---------------------------------------------------------------------------
# Pallas kernel: obs QBN -> policy MLP -> hidden QBN -> softmax head
# Activations are [features(sublanes), batch(lanes)]; weights are [out, in].
# ---------------------------------------------------------------------------
def mmnet_kernel(w_ref, b_ref, x_ref, out_ref):
    x = x_ref[...]                                              # [32, Bblk]

    # --- observation quantized bottleneck (obs_qb_net) ---------------------
    e = jnp.dot(w_ref[0], x, preferred_element_type=jnp.float32) + b_ref[0]
    q_obs = _ternary_quantize_from_preact(e)
    x_d = jnp.tanh(
        jnp.dot(w_ref[1], q_obs, preferred_element_type=jnp.float32) + b_ref[1]
    )

    # --- policy hidden layer -------------------------------------------------
    h = jnp.maximum(
        jnp.dot(w_ref[2], x_d, preferred_element_type=jnp.float32) + b_ref[2],
        0.0,
    )

    # --- hidden-state quantized bottleneck (hidden_qb_net) -------------------
    he = jnp.dot(w_ref[3], h, preferred_element_type=jnp.float32) + b_ref[3]
    q_hid = _ternary_quantize_from_preact(he)
    h_d = jnp.tanh(
        jnp.dot(w_ref[4], q_hid, preferred_element_type=jnp.float32) + b_ref[4]
    )

    # TODO(synk): comm_qb_net is None in this MMNet instantiation, so no
    # communication-channel quantization stage is emitted.

    # --- action head + softmax over the action (sublane) axis ----------------
    logits = jnp.dot(w_ref[5], h_d, preferred_element_type=jnp.float32) + b_ref[5]
    logits = logits[:NUM_ACTIONS, :]                            # [8, Bblk]
    m = jnp.max(logits, axis=0, keepdims=True)
    ex = jnp.exp(logits - m)
    denom = jnp.sum(ex, axis=0, keepdims=True)
    probs = ex * pl.reciprocal(denom, approx=True)
    out_ref[...] = probs.astype(out_ref.dtype)                  # lane-dense store


# ---------------------------------------------------------------------------
# Parameter packing: 12 tensors -> one weight slab + one bias slab
# ---------------------------------------------------------------------------
def pack_params(p):
    order = [("oe_w", "oe_b"), ("od_w", "od_b"), ("p1_w", "p1_b"),
             ("he_w", "he_b"), ("hd_w", "hd_b"), ("p2_w", "p2_b")]
    w_tiles, b_tiles = [], []
    for wk, bk in order:
        w = p[wk].T.astype(jnp.float32)                 # [out, in]
        out_d, in_d = w.shape
        w_tiles.append(
            jnp.zeros((FEAT_PAD, FEAT_PAD), jnp.float32).at[:out_d, :in_d].set(w)
        )
        b = p[bk].reshape(-1).astype(jnp.float32)       # [out]
        b_tiles.append(
            jnp.zeros((FEAT_PAD, 1), jnp.float32).at[: b.shape[0], 0].set(b)
        )
    return jnp.stack(w_tiles), jnp.stack(b_tiles)       # [6,32,32], [6,32,1]


# ---------------------------------------------------------------------------
# Wrapper: layout plumbing + gridded pallas_call
# ---------------------------------------------------------------------------
def mmnet_forward(x, params):
    wslab, bslab = pack_params(params)

    batch = x.shape[0]
    num_blocks = pl.cdiv(batch, BATCH_BLOCK)
    b_pad = num_blocks * BATCH_BLOCK

    # [batch, obs] -> [obs(sublanes), batch(lanes)], zero-padded batch.
    x_t = jnp.zeros((FEAT_PAD, b_pad), jnp.float32).at[:OBS_DIM, :batch].set(
        x.astype(jnp.float32).T
    )

    cost = pl.CostEstimate(
        flops=2 * N_LAYERS * FEAT_PAD * FEAT_PAD * b_pad,
        transcendentals=b_pad * (2 * FEAT_PAD + NUM_ACTIONS + 1),
        bytes_accessed=4 * (FEAT_PAD * b_pad
                            + N_LAYERS * FEAT_PAD * FEAT_PAD
                            + N_LAYERS * FEAT_PAD
                            + NUM_ACTIONS * b_pad),
    )

    out_t = pl.pallas_call(
        mmnet_kernel,
        grid=(num_blocks,),
        in_specs=[
            # weight / bias slabs: same block every step -> stay VMEM-resident
            pl.BlockSpec((N_LAYERS, FEAT_PAD, FEAT_PAD), lambda i: (0, 0, 0)),
            pl.BlockSpec((N_LAYERS, FEAT_PAD, 1), lambda i: (0, 0, 0)),
            # activations: one lane-dense batch block per grid step
            pl.BlockSpec((FEAT_PAD, BATCH_BLOCK), lambda i: (0, i)),
        ],
        out_specs=pl.BlockSpec((NUM_ACTIONS, BATCH_BLOCK), lambda i: (0, i)),
        out_shape=jax.ShapeDtypeStruct((NUM_ACTIONS, b_pad), jnp.float32),
        compiler_params=pltpu.CompilerParams(
            dimension_semantics=("parallel",)),
        cost_estimate=cost,
    )(wslab, bslab, x_t)

    # [actions, batch] -> [batch, actions], drop batch padding.
    return out_t[:, :batch].T


# ---------------------------------------------------------------------------
# Pure-JAX reference (original [batch, feature] layout, two-tanh quantizer)
# ---------------------------------------------------------------------------
def mmnet_reference(x, p):
    e = x @ p["oe_w"] + p["oe_b"]
    q_obs = _ternary_tanh_quantize(e)
    x_d = jnp.tanh(q_obs @ p["od_w"] + p["od_b"])
    h = jnp.maximum(x_d @ p["p1_w"] + p["p1_b"], 0.0)
    he = h @ p["he_w"] + p["he_b"]
    q_hid = _ternary_tanh_quantize(he)
    h_d = jnp.tanh(q_hid @ p["hd_w"] + p["hd_b"])
    logits = h_d @ p["p2_w"] + p["p2_b"]
    return jax.nn.softmax(logits, axis=-1)


# ---------------------------------------------------------------------------
# Deterministic parameter init
# ---------------------------------------------------------------------------
def init_params(key):
    ks = jax.random.split(key, 12)

    def lin(kw, fan_in, fan_out):
        scale = 1.0 / jnp.sqrt(jnp.float32(fan_in))
        return jax.random.uniform(kw, (fan_in, fan_out), jnp.float32, -scale, scale)

    return {
        "oe_w": lin(ks[0], OBS_DIM, OBS_QB_DIM),
        "oe_b": jax.random.normal(ks[1], (1, OBS_QB_DIM), jnp.float32) * 0.05,
        "od_w": lin(ks[2], OBS_QB_DIM, OBS_DIM),
        "od_b": jax.random.normal(ks[3], (1, OBS_DIM), jnp.float32) * 0.05,
        "p1_w": lin(ks[4], OBS_DIM, HIDDEN_DIM),
        "p1_b": jax.random.normal(ks[5], (1, HIDDEN_DIM), jnp.float32) * 0.05,
        "he_w": lin(ks[6], HIDDEN_DIM, HID_QB_DIM),
        "he_b": jax.random.normal(ks[7], (1, HID_QB_DIM), jnp.float32) * 0.05,
        "hd_w": lin(ks[8], HID_QB_DIM, HIDDEN_DIM),
        "hd_b": jax.random.normal(ks[9], (1, HIDDEN_DIM), jnp.float32) * 0.05,
        "p2_w": lin(ks[10], HIDDEN_DIM, NUM_ACTIONS),
        "p2_b": jax.random.normal(ks[11], (1, NUM_ACTIONS), jnp.float32) * 0.05,
    }


if __name__ == "__main__":
    key = jax.random.PRNGKey(0)
    k_x, k_p = jax.random.split(key)
    x = jax.random.normal(k_x, (BATCH, OBS_DIM), jnp.float32)
    params = init_params(k_p)

    out = mmnet_forward(x, params)
    out = jax.block_until_ready(out)

    ref = mmnet_reference(x, params)
    assert out.shape == (BATCH, NUM_ACTIONS)

    # Per-row comparison.  Tolerance covers the approx (EUP) reciprocal in the
    # softmax; the >=99% row requirement tolerates the measure-zero case of a
    # pre-activation landing within float rounding of the ternary-quantizer
    # boundary (where MXU-vs-XLA rounding can legitimately flip a bin).
    row_err = jnp.max(jnp.abs(out - ref), axis=-1)
    row_tol = 2e-3 + 2e-3 * jnp.max(jnp.abs(ref), axis=-1)
    frac_ok = float(jnp.mean((row_err <= row_tol).astype(jnp.float32)))
    assert frac_ok >= 0.99, f"only {frac_ok:.4f} of rows match the reference"
    assert float(jnp.max(jnp.abs(jnp.sum(out, axis=-1) - 1.0))) < 5e-3, \
        "softmax not normalized"

    print("KERNEL_OK")
</pallas_src>

<mosaic_0001>
module attributes {stable_mosaic.version = 11 : i64} {
  func.func @mmnet_kernel(%arg0: i32, %arg1: memref<6x32x32xf32, #tpu.memory_space<vmem>>, %arg2: memref<6x32x1xf32, #tpu.memory_space<vmem>>, %arg3: memref<32x256xf32, #tpu.memory_space<vmem>>, %arg4: memref<8x256xf32, #tpu.memory_space<vmem>>) attributes {dimension_semantics = [#tpu.dimension_semantics<parallel>], iteration_bounds = array<i64: 2>, scalar_prefetch = 0 : i64, scratch_operands = 0 : i64, tpu.core_type = #tpu.core_type<tc>, window_params = [{pipeline_mode = #tpu.pipeline_mode<synchronous>, transform_indices = @transform_0, window_bounds = array<i64: 6, 32, 32>}, {pipeline_mode = #tpu.pipeline_mode<synchronous>, transform_indices = @transform_1, window_bounds = array<i64: 6, 32, 1>}, {transform_indices = @transform_2, window_bounds = array<i64: 32, 256>}, {transform_indices = @transform_3, window_bounds = array<i64: 8, 256>}]} {
    %c0 = arith.constant 0 : index
    %c0_0 = arith.constant 0 : index
    %0 = vector.load %arg3[%c0, %c0_0] : memref<32x256xf32, #tpu.memory_space<vmem>>, vector<32x256xf32>
    %c0_1 = arith.constant 0 : index
    %c0_2 = arith.constant 0 : index
    %c0_3 = arith.constant 0 : index
    %1 = vector.load %arg1[%c0_1, %c0_2, %c0_3] : memref<6x32x32xf32, #tpu.memory_space<vmem>>, vector<1x32x32xf32>
    %2 = vector.shape_cast %1 : vector<1x32x32xf32> to vector<32x32xf32>
    %cst = arith.constant dense<0.000000e+00> : vector<32x256xf32>
    %3 = tpu.matmul %2, %0, %cst {dimension_numbers = #tpu.dot_dimension_numbers<[1], [0], [0], [1], [0, 0, 1, 1], [], []>} : vector<32x32xf32>, vector<32x256xf32>, vector<32x256xf32> -> vector<32x256xf32>
    %c0_4 = arith.constant 0 : index
    %c0_5 = arith.constant 0 : index
    %c0_6 = arith.constant 0 : index
    %4 = vector.load %arg2[%c0_4, %c0_5, %c0_6] : memref<6x32x1xf32, #tpu.memory_space<vmem>>, vector<1x32x1xf32>
    %5 = vector.shape_cast %4 : vector<1x32x1xf32> to vector<32x1xf32>
    %6 = vector.broadcast %5 : vector<32x1xf32> to vector<32x256xf32>
    %7 = arith.addf %3, %6 : vector<32x256xf32>
    %cst_7 = arith.constant 0.794675946 : f32
    %8 = vector.broadcast %cst_7 : f32 to vector<32x256xf32>
    %9 = arith.cmpf ogt, %7, %8 : vector<32x256xf32>
    %cst_8 = arith.constant -0.794675946 : f32
    %10 = vector.broadcast %cst_8 : f32 to vector<32x256xf32>
    %11 = arith.cmpf olt, %7, %10 : vector<32x256xf32>
    %cst_9 = arith.constant -1.000000e+00 : f32
    %cst_10 = arith.constant 0.000000e+00 : f32
    %12 = vector.broadcast %cst_9 : f32 to vector<32x256xf32>
    %13 = vector.broadcast %cst_10 : f32 to vector<32x256xf32>
    %14 = arith.select %11, %12, %13 : vector<32x256xi1>, vector<32x256xf32>
    %cst_11 = arith.constant 1.000000e+00 : f32
    %15 = vector.broadcast %cst_11 : f32 to vector<32x256xf32>
    %16 = arith.select %9, %15, %14 : vector<32x256xi1>, vector<32x256xf32>
    %c1 = arith.constant 1 : index
    %c0_12 = arith.constant 0 : index
    %c0_13 = arith.constant 0 : index
    %17 = vector.load %arg1[%c1, %c0_12, %c0_13] : memref<6x32x32xf32, #tpu.memory_space<vmem>>, vector<1x32x32xf32>
    %18 = vector.shape_cast %17 : vector<1x32x32xf32> to vector<32x32xf32>
    %cst_14 = arith.constant dense<0.000000e+00> : vector<32x256xf32>
    %19 = tpu.matmul %18, %16, %cst_14 {dimension_numbers = #tpu.dot_dimension_numbers<[1], [0], [0], [1], [0, 0, 1, 1], [], []>} : vector<32x32xf32>, vector<32x256xf32>, vector<32x256xf32> -> vector<32x256xf32>
    %c1_15 = arith.constant 1 : index
    %c0_16 = arith.constant 0 : index
    %c0_17 = arith.constant 0 : index
    %20 = vector.load %arg2[%c1_15, %c0_16, %c0_17] : memref<6x32x1xf32, #tpu.memory_space<vmem>>, vector<1x32x1xf32>
    %21 = vector.shape_cast %20 : vector<1x32x1xf32> to vector<32x1xf32>
    %22 = vector.broadcast %21 : vector<32x1xf32> to vector<32x256xf32>
    %23 = arith.addf %19, %22 : vector<32x256xf32>
    %24 = math.tanh %23 : vector<32x256xf32>
    %c2 = arith.constant 2 : index
    %c0_18 = arith.constant 0 : index
    %c0_19 = arith.constant 0 : index
    %25 = vector.load %arg1[%c2, %c0_18, %c0_19] : memref<6x32x32xf32, #tpu.memory_space<vmem>>, vector<1x32x32xf32>
    %26 = vector.shape_cast %25 : vector<1x32x32xf32> to vector<32x32xf32>
    %cst_20 = arith.constant dense<0.000000e+00> : vector<32x256xf32>
    %27 = tpu.matmul %26, %24, %cst_20 {dimension_numbers = #tpu.dot_dimension_numbers<[1], [0], [0], [1], [0, 0, 1, 1], [], []>} : vector<32x32xf32>, vector<32x256xf32>, vector<32x256xf32> -> vector<32x256xf32>
    %c2_21 = arith.constant 2 : index
    %c0_22 = arith.constant 0 : index
    %c0_23 = arith.constant 0 : index
    %28 = vector.load %arg2[%c2_21, %c0_22, %c0_23] : memref<6x32x1xf32, #tpu.memory_space<vmem>>, vector<1x32x1xf32>
    %29 = vector.shape_cast %28 : vector<1x32x1xf32> to vector<32x1xf32>
    %30 = vector.broadcast %29 : vector<32x1xf32> to vector<32x256xf32>
    %31 = arith.addf %27, %30 : vector<32x256xf32>
    %cst_24 = arith.constant 0.000000e+00 : f32
    %32 = vector.broadcast %cst_24 : f32 to vector<32x256xf32>
    %33 = arith.maximumf %31, %32 : vector<32x256xf32>
    %c3 = arith.constant 3 : index
    %c0_25 = arith.constant 0 : index
    %c0_26 = arith.constant 0 : index
    %34 = vector.load %arg1[%c3, %c0_25, %c0_26] : memref<6x32x32xf32, #tpu.memory_space<vmem>>, vector<1x32x32xf32>
    %35 = vector.shape_cast %34 : vector<1x32x32xf32> to vector<32x32xf32>
    %cst_27 = arith.constant dense<0.000000e+00> : vector<32x256xf32>
    %36 = tpu.matmul %35, %33, %cst_27 {dimension_numbers = #tpu.dot_dimension_numbers<[1], [0], [0], [1], [0, 0, 1, 1], [], []>} : vector<32x32xf32>, vector<32x256xf32>, vector<32x256xf32> -> vector<32x256xf32>
    %c3_28 = arith.constant 3 : index
    %c0_29 = arith.constant 0 : index
    %c0_30 = arith.constant 0 : index
    %37 = vector.load %arg2[%c3_28, %c0_29, %c0_30] : memref<6x32x1xf32, #tpu.memory_space<vmem>>, vector<1x32x1xf32>
    %38 = vector.shape_cast %37 : vector<1x32x1xf32> to vector<32x1xf32>
    %39 = vector.broadcast %38 : vector<32x1xf32> to vector<32x256xf32>
    %40 = arith.addf %36, %39 : vector<32x256xf32>
    %cst_31 = arith.constant 0.794675946 : f32
    %41 = vector.broadcast %cst_31 : f32 to vector<32x256xf32>
    %42 = arith.cmpf ogt, %40, %41 : vector<32x256xf32>
    %cst_32 = arith.constant -0.794675946 : f32
    %43 = vector.broadcast %cst_32 : f32 to vector<32x256xf32>
    %44 = arith.cmpf olt, %40, %43 : vector<32x256xf32>
    %cst_33 = arith.constant -1.000000e+00 : f32
    %cst_34 = arith.constant 0.000000e+00 : f32
    %45 = vector.broadcast %cst_33 : f32 to vector<32x256xf32>
    %46 = vector.broadcast %cst_34 : f32 to vector<32x256xf32>
    %47 = arith.select %44, %45, %46 : vector<32x256xi1>, vector<32x256xf32>
    %cst_35 = arith.constant 1.000000e+00 : f32
    %48 = vector.broadcast %cst_35 : f32 to vector<32x256xf32>
    %49 = arith.select %42, %48, %47 : vector<32x256xi1>, vector<32x256xf32>
    %c4 = arith.constant 4 : index
    %c0_36 = arith.constant 0 : index
    %c0_37 = arith.constant 0 : index
    %50 = vector.load %arg1[%c4, %c0_36, %c0_37] : memref<6x32x32xf32, #tpu.memory_space<vmem>>, vector<1x32x32xf32>
    %51 = vector.shape_cast %50 : vector<1x32x32xf32> to vector<32x32xf32>
    %cst_38 = arith.constant dense<0.000000e+00> : vector<32x256xf32>
    %52 = tpu.matmul %51, %49, %cst_38 {dimension_numbers = #tpu.dot_dimension_numbers<[1], [0], [0], [1], [0, 0, 1, 1], [], []>} : vector<32x32xf32>, vector<32x256xf32>, vector<32x256xf32> -> vector<32x256xf32>
    %c4_39 = arith.constant 4 : index
    %c0_40 = arith.constant 0 : index
    %c0_41 = arith.constant 0 : index
    %53 = vector.load %arg2[%c4_39, %c0_40, %c0_41] : memref<6x32x1xf32, #tpu.memory_space<vmem>>, vector<1x32x1xf32>
    %54 = vector.shape_cast %53 : vector<1x32x1xf32> to vector<32x1xf32>
    %55 = vector.broadcast %54 : vector<32x1xf32> to vector<32x256xf32>
    %56 = arith.addf %52, %55 : vector<32x256xf32>
    %57 = math.tanh %56 : vector<32x256xf32>
    %c5 = arith.constant 5 : index
    %c0_42 = arith.constant 0 : index
    %c0_43 = arith.constant 0 : index
    %58 = vector.load %arg1[%c5, %c0_42, %c0_43] : memref<6x32x32xf32, #tpu.memory_space<vmem>>, vector<1x32x32xf32>
    %59 = vector.shape_cast %58 : vector<1x32x32xf32> to vector<32x32xf32>
    %cst_44 = arith.constant dense<0.000000e+00> : vector<32x256xf32>
    %60 = tpu.matmul %59, %57, %cst_44 {dimension_numbers = #tpu.dot_dimension_numbers<[1], [0], [0], [1], [0, 0, 1, 1], [], []>} : vector<32x32xf32>, vector<32x256xf32>, vector<32x256xf32> -> vector<32x256xf32>
    %c5_45 = arith.constant 5 : index
    %c0_46 = arith.constant 0 : index
    %c0_47 = arith.constant 0 : index
    %61 = vector.load %arg2[%c5_45, %c0_46, %c0_47] : memref<6x32x1xf32, #tpu.memory_space<vmem>>, vector<1x32x1xf32>
    %62 = vector.shape_cast %61 : vector<1x32x1xf32> to vector<32x1xf32>
    %63 = vector.broadcast %62 : vector<32x1xf32> to vector<32x256xf32>
    %64 = arith.addf %60, %63 : vector<32x256xf32>
    %65 = vector.extract_strided_slice %64 {offsets = [0, 0], sizes = [8, 256], strides = [1, 1]} : vector<32x256xf32> to vector<8x256xf32>
    %cst_48 = arith.constant dense<0xFF800000> : vector<256xf32>
    %66 = vector.multi_reduction <maximumf>, %65, %cst_48 [0] : vector<8x256xf32> to vector<256xf32>
    %67 = vector.shape_cast %66 : vector<256xf32> to vector<1x256xf32>
    %68 = vector.broadcast %67 : vector<1x256xf32> to vector<8x256xf32>
    %69 = arith.subf %65, %68 : vector<8x256xf32>
    %70 = math.exp %69 : vector<8x256xf32>
    %cst_49 = arith.constant dense<0.000000e+00> : vector<256xf32>
    %71 = vector.multi_reduction <add>, %70, %cst_49 [0] : vector<8x256xf32> to vector<256xf32>
    %72 = vector.shape_cast %71 : vector<256xf32> to vector<1x256xf32>
    %73 = tpu.reciprocal %72 {approx = true} : vector<1x256xf32> -> vector<1x256xf32>
    %74 = vector.broadcast %73 : vector<1x256xf32> to vector<8x256xf32>
    %75 = arith.mulf %70, %74 : vector<8x256xf32>
    %c0_50 = arith.constant 0 : index
    %c0_51 = arith.constant 0 : index
    %76 = vector.load %arg4[%c0_50, %c0_51] : memref<8x256xf32, #tpu.memory_space<vmem>>, vector<8x256xf32>
    tpu.vector_store %arg4[%c0_50, %c0_51], %75 {strides = array<i32>} : memref<8x256xf32, #tpu.memory_space<vmem>>, vector<8x256xf32>,
    return
  }
  func.func @transform_0(%arg0: i32) -> (i32, i32, i32) {
    %c0_i32 = arith.constant 0 : i32
    %c0_i32_0 = arith.constant 0 : i32
    %c0_i32_1 = arith.constant 0 : i32
    %c0_i32_2 = arith.constant 0 : i32
    return %c0_i32, %c0_i32_0, %c0_i32_1 : i32, i32, i32
  }
  func.func @transform_1(%arg0: i32) -> (i32, i32, i32) {
    %c0_i32 = arith.constant 0 : i32
    %c0_i32_0 = arith.constant 0 : i32
    %c0_i32_1 = arith.constant 0 : i32
    %c0_i32_2 = arith.constant 0 : i32
    return %c0_i32, %c0_i32_0, %c0_i32_1 : i32, i32, i32
  }
  func.func @transform_2(%arg0: i32) -> (i32, i32) {
    %c0_i32 = arith.constant 0 : i32
    %c0_i32_0 = arith.constant 0 : i32
    return %c0_i32, %arg0 : i32, i32
  }
  func.func @transform_3(%arg0: i32) -> (i32, i32) {
    %c0_i32 = arith.constant 0 : i32
    %c0_i32_0 = arith.constant 0 : i32
    return %c0_i32, %arg0 : i32, i32
  }
}

</mosaic_0001>

<bundles_post_ra>
// kernel: tpu_custom_call.1
= control target key start
LH: loop header
LB: loop body
LE: loop exit
PB: predicated region body
PF: predicated region fallthrough
CT: control target
= control target key end

     0   :  { %8 = vsyncpa [#allocation3], 0  ;;  %s1892_s0 = inlined_call_operand.vmem [shape: f32[6,32,32], index: 0, kind: input, shape index: {}]   ;;  %s1893_s1 = inlined_call_operand.vmem [shape: f32[6,32,1], index: 1, kind: input, shape index: {}]   ;;  %s1894_s2 = inlined_call_operand.hbm [shape: f32[32,512], index: 2, kind: input, shape index: {}]   ;;  %s1895_s3 = inlined_call_operand.hbm [shape: f32[8,512], index: 3, kind: output, shape index: {}]  }
   0x1   :  { %10 = vsyncpa [#allocation3 + $0x1], 0 }
   0x2   :  { %11 = vsyncpa [#allocation4], 0 }
   0x3   :  { %13 = vsyncpa [#allocation4 + $0x1], 0  ;;  %s1530_s12 = smov 0   ;;  %s1532_s13 = smov 0  }
   0x4   :  { %s1534_s14 = smov 0   ;;  %s1536_s15 = smov 0  }
   0x5 LB: > { %s1551_s16 = sadd.s32 4294967295, %s1501_s15   ;;  %s1184_s17 = sadd.s32 4294967294, %s1501_s15   ;;  %s1501_s15 = sphi %s1536_s15, %s1909_s15   ;;  %s1497_s14 = sphi %s1534_s14, %s1908_s14   ;;  %s1493_s13 = sphi %s1532_s13, %s1907_s13   ;;  %s1489_s12 = sphi %s1530_s12, %s1906_s12  }
   0x6   : > { %s1555_s18 = sadd.s32 1, %s1501_s15   ;;  %s68_s19 = sadd.s32 1, %s1497_s14 }
   0x7   : > { %s65_s20 = ssub.s32 %s1501_s15, %s1555_s18  ;;  %p75_p0 = scmp.ne.s32.totalorder %s1497_s14, %s1493_s13 }
   0x8   : > { %p66_p1 = scmp.eq.s32.totalorder %s65_s20, 0  ;;  %p76_p2 = scmp.eq.s32.totalorder %s1501_s15, 0 }
   0x9   : > { %p81_p3 = scmp.ne.s32.totalorder %s1493_s13, %s1489_s12  ;;  %p82_p4 = scmp.eq.s32.totalorder %s1551_s16, 0 }
   0xa   : > { %s1567_s21 = scalar_select %p66_p1, %s1497_s14, %s68_s19  }
   0xb   : > { %p1569_p5 = por %p76_p2, %p75_p0  ;;  %p1573_p6 = por %p82_p4, %p81_p3 }
   0xc   : > { %p105_p7 = scmp.eq.s32.totalorder %s1551_s16, 1  ;;  %p111_p8 = scmp.eq.s32.totalorder %s1184_s17, 1 }
   0xd   : > { %p1324_p10 = scmp.lt.s32.totalorder %s1501_s15, 2  ;;  %s137_s26 = sand.u32 1, %s1497_s14  }
   0xe   : > { %p1580_p11 = por %p105_p7, %p75_p0  ;;  %p1584_p12 = por %p111_p8, %p81_p3 }
   0xf   : > { %s1262_s27 = sshll.u32 %s1501_s15, 8  ;;  %s1187_s28 = sshll.u32 %s137_s26, 6 }
  0x10   : > { %s1899_s24 = scalar_select %p1580_p11, 1, 0 }
  0x11   : > { %s1900_s25 = scalar_select %p1584_p12, 1, 0 }
  0x12   : > { %s1593_s4 = scalar_lea.hbm %s1894_s2, %s1262_s27  ;;  %s141_s5 = scalar_lea.vmem [#allocation2], %s1187_s28 }
  0x13   : > { %s148_s6 = sshll.u32 %s141_s5, 4  ;;  %p1597_p13 = pnand %p1324_p10, %p1569_p5  ;;  %s1601_s6 = int_to_ptr.vmem [resolvable:$true] %s148_s6 }
  0x14   : > { %s1604_s8 = scalar_lea.sflag [#allocation3], %s137_s26  ;;  %s1405_s9 = scalar_lea.hbm %s1593_s4, 1024 }
  0x15   : > { %p1406_p1 = scmp.ne.s32.totalorder %s1593_s4, %s1405_s9  ;;  %p1407_p2 = pneg %p1597_p13 }
  0x16   : > { %s1410_s17 = scalar_lea.hbm %s1894_s2, 2048  ;;  %p1411_p5 = scmp.lt.u32.totalorder %s1593_s4, %s1894_s2 }
  0x17   : > { %p1408_p3 = pnand %p1407_p2, %p1406_p1  ;;  %p1412_p7 = scmp.lt.u32.totalorder %s1410_s17, %s1405_s9 }
  0x18   : > { %p1414_p10 = scmp.lt.u32.totalorder %s1405_s9, %s1593_s4 }
  0x19   : > { %p1409_p4 = pneg %p1408_p3  ;;  %p1413_p8 = por %p1412_p7, %p1411_p5 }
  0x1b   : > { %p1415_p9 = por %p1414_p10, %p1413_p8 }
  0x1d   : > { %p1416_p0 = pnand %p1415_p9, %p1409_p4 }
  0x1f   : > { %1419 = shalt.err (!%p1416_p0)
}
  0x20   : > { %s1420_s22 = scalar_lea.vmem %s1601_s6, 1024  ;;  %s1503_s26 = smov [#allocation2]  }
  0x21   : > { %p1421_p1 = scmp.ne.s32.totalorder %s1601_s6, %s1420_s22  ;;  %s1425_s27 = sshll.u32 %s1503_s26, 4  ;;  %s1426_s27 = int_to_ptr.vmem [resolvable:$false] %s1425_s27 }
  0x22   : > { %s1427_s28 = scalar_lea.vmem %s1426_s27, 2048  ;;  %p1428_p11 = scmp.lt.s32.totalorder %s1601_s6, %s1426_s27 }
  0x23   : > { %p1423_p3 = pnand %p1421_p1, %p1407_p2  ;;  %p1429_p5 = scmp.lt.s32.totalorder %s1427_s28, %s1420_s22 }
  0x25   : > { %p1424_p12 = pneg %p1423_p3  ;;  %p1430_p7 = por %p1429_p5, %p1428_p11 }
  0x27   : > { %p1431_p8 = pnand %p1430_p7, %p1424_p12 }
  0x29   : > { %1434 = shalt.err (!%p1431_p8)
}
  0x2a   : > { %s1504_s29 = smov 512   ;;  %s1505_s30 = smov 256  }
  0x2b   : > { %s1506_s5 = smov 16   ;;  %p156_p9 = scmp.lt.s32.totalorder %s1501_s15, 3 }
  0x2c   : > { %1319 = dma.hbm_to_vmem [thread:$0]  (!%p1597_p13), %s1593_s4, 1024, %s1601_s6, %s1604_s8, %s1504_s29, %s1505_s30, %s1506_s5  }
  0x2d   : > { %p1902_p0 = scmp.ge.s32.totalorder %s1501_s15, 1 }
  0x2f   : > { %p157_p2 = pnand %p1902_p0, %p156_p9 }
  0x30   : > { %s1636_s9 = sand.u32 (!%p157_p2), 1, %s1493_s13  }
  0x31   : > { %160 = sbr.rel (%p157_p2) target bundleno = 1544 (0x608), region = 32  ;;  %s1191_s10 = sshll.u32 (!%p157_p2), %s1636_s9, 6 }
  0x32   : > { %s163_s11 = scalar_lea.sflag (!%p157_p2), [#allocation3], %s1636_s9  ;;  %s166_s17 = scalar_lea.vmem (!%p157_p2), [#allocation2], %s1191_s10 }
  0x38   : > { %1480 = dma.done.wait (%p1573_p6), %s163_s11, 1024  }
  0x39   : > { %1482 = vsyncadd (%p1573_p6), %s163_s11, 4294966272  ;;  %v1507_v0 = vmov 0.0   ;;  %v1508_v1 = vmov 0   ;;  %v192_v2 = vld [vmem:[%s166_s17 + $0x8] sm:$0xff]  ;;  %v194_v3 = vld [vmem:[%s166_s17 + $0x18] sm:$0xff]  ;;  %vm227_vm0 = vcmask 261120  }
  0x3a   : > { %304 = vmatprep.mubr.f32.mxu0 %v1507_v0  ;;  %1363 = vset.pattern.permute.xlu0 %v1508_v1  ;;  %v191_v4 = vld [vmem:[%s166_s17] sm:$0xff]  ;;  %v1264_v5 = vpack.c.bf16 %v194_v3, %v192_v2  ;;  %v193_v6 = vld [vmem:[%s166_s17 + $0x10] sm:$0xff]  ;;  %v196_v7 = vld [vmem:[%s166_s17 + $0x28] sm:$0xff]  ;;  %s1192_s19 = sshll.u32 %s1636_s9, 4  ;;  %s1263_s20 = sshll.u32 %s1551_s16, 8 }
  0x3b   : > { %1364 = vset.pattern.permute.xlu1 %v1508_v1  ;;  %467 = vmatprep.mubr.f32.mxu1 %v1507_v0  ;;  %v198_v8 = vld [vmem:[%s166_s17 + $0x38] sm:$0xff]  ;;  %v1266_v9 = vpack.c.bf16 %v193_v6, %v191_v4  ;;  %v195_v11 = vld [vmem:[%s166_s17 + $0x20] sm:$0xff]  ;;  %v197_v12 = vld [vmem:[%s166_s17 + $0x30] sm:$0xff]  ;;  %s188_s22 = scalar_lea.vmem [#allocation5], %s1192_s19  ;;  %s1848_s29 = scalar_lea.hbm %s1895_s3, %s1263_s20 }
  0x3c   : > { %v1268_v10 = vpack.c.bf16 %v198_v8, %v196_v7  ;;  %1265 = vmatprep.subr.bf16.mxu0 %v1264_v5  ;;  %v1270_v13 = vpack.c.bf16 %v197_v12, %v195_v11  ;;  %v203_v14 = vld [vmem:[%s1893_s1] sm:$0xff]  ;;  %v205_v15 = vld [vmem:[%s1893_s1 + $0x10] sm:$0xff]  ;;  %v204_v16 = vld [vmem:[%s1893_s1 + $0x8] sm:$0xff]  ;;  %s1114_s26 = sshll.u32 %s188_s22, 4  ;;  %s1100_s30 = scalar_lea.sflag [#allocation4], %s1636_s9  ;;  %s1850_s26 = int_to_ptr.vmem [resolvable:$true] %s1114_s26 }
  0x3d   : > { %1267 = vmatpush1.bf16.msra.mxu0 %v1266_v9  ;;  %209 = vperm.xlu0 %1363, %v203_v14   ;;  %v206_v17 = vld [vmem:[%s1893_s1 + $0x18] sm:$0xff]  ;;  %v199_v18 = vld [vmem:[%s1892_s0] sm:$0xff]  ;;  %v1202_v20 = vld [vmem:[%s1893_s1 + $0x28] sm:$0xff]  ;;  %s1435_s16 = scalar_lea.vmem %s1850_s26, 256  ;;  %p1903_p11 = scmp.ne.s32.totalorder %s1899_s24, 0 }
  0x3e   : > { %1269 = vmatprep.subr.bf16.mxu0 %v1268_v10  ;;  %219 = vperm.xlu1 %1364, %v205_v15   ;;  %v1201_v19 = vld [vmem:[%s1893_s1 + $0x20] sm:$0xff]  ;;  %v200_v21 = vld [vmem:[%s1892_s0 + $0x8] sm:$0xff]  ;;  %v1203_v22 = vld [vmem:[%s1893_s1 + $0x30] sm:$0xff]  ;;  %p1436_p6 = scmp.ne.s32.totalorder %s1850_s26, %s1435_s16  ;;  %s1509_s5 = smov [#allocation5]  }
  0x3f   : > { %v1204_v23 = vld [vmem:[%s1893_s1 + $0x38] sm:$0xff]  ;;  %v201_v24 = vld [vmem:[%s1892_s0 + $0x10] sm:$0xff]  ;;  %v1213_v25 = vld [vmem:[%s1893_s1 + $0x40] sm:$0xff]  ;;  %s1439_s10 = sshll.u32 %s1509_s5, 4  ;;  %s1440_s10 = int_to_ptr.vmem [resolvable:$false] %s1439_s10 }
  0x40   : > { %v1214_v26 = vld [vmem:[%s1893_s1 + $0x48] sm:$0xff]  ;;  %v202_v27 = vld [vmem:[%s1892_s0 + $0x18] sm:$0xff]  ;;  %v1215_v28 = vld [vmem:[%s1893_s1 + $0x50] sm:$0xff]  ;;  %p1437_p12 = pnand %p1436_p6, %p1903_p11  ;;  %s1441_s11 = scalar_lea.vmem %s1440_s10, 512 }
  0x41   : > { %1271 = vmatpush1.bf16.msra.mxu0 %v1270_v13  ;;  %214 = vperm.xlu0 %1363, %v204_v16   ;;  %v1216_v29 = vld [vmem:[%s1893_s1 + $0x58] sm:$0xff]  ;;  %v1225_v30 = vld [vmem:[%s1893_s1 + $0x60] sm:$0xff]  ;;  %v1226_v31 = vld [vmem:[%s1893_s1 + $0x68] sm:$0xff]  ;;  %p1442_p4 = scmp.lt.s32.totalorder %s1850_s26, %s1440_s10  ;;  %p1443_p10 = scmp.lt.s32.totalorder %s1441_s11, %s1435_s16 }
  0x42   : > { %224 = vperm.xlu1 %1364, %v206_v17   ;;  %v1227_v32 = vld [vmem:[%s1893_s1 + $0x70] sm:$0xff]  ;;  %v1228_v33 = vld [vmem:[%s1893_s1 + $0x78] sm:$0xff]  ;;  %v1237_v34 = vld [vmem:[%s1893_s1 + $0x80] sm:$0xff]  ;;  %p1438_p13 = pneg %p1437_p12 }
  0x43   : > { %v1238_v35 = vld [vmem:[%s1893_s1 + $0x88] sm:$0xff]  ;;  %v1239_v36 = vld [vmem:[%s1893_s1 + $0x90] sm:$0xff]  ;;  %v1240_v37 = vld [vmem:[%s1893_s1 + $0x98] sm:$0xff]  ;;  %p1444_p1 = por %p1443_p10, %p1442_p4 }
  0x44   : > { %1193 = vmatmul.mubr.msk.f32.vlgmr.msra.gmra.mrb[0].mxu0 %vm227_vm0, %v199_v18  ;;  %v1249_v38 = vld [vmem:[%s1893_s1 + $0xa0] sm:$0xff]  ;;  %v1198_v17 = vld [vmem:[%s1892_s0 + $0x28] sm:$0xff]  ;;  %v1199_v18 = vld [vmem:[%s1892_s0 + $0x30] sm:$0xff] }
  0x45   : > { %310 = vmatprep.mubr.f32.mxu0 %v1507_v0  ;;  %373 = vperm.xlu0 %1363, %v1201_v19   ;;  %v1197_v16 = vld [vmem:[%s1892_s0 + $0x20] sm:$0xff]  ;;  %v1200_v19 = vld [vmem:[%s1892_s0 + $0x38] sm:$0xff]  ;;  %p1445_p3 = pnand %p1444_p1, %p1438_p13 }
  0x46   : > { %378 = vperm.xlu1 %1364, %v1202_v20  }
  0x48   : > { %1194 = vmatmul.mubr.msk.f32.gmra.mrb[2].mxu0 %vm227_vm0, %v200_v21 }
  0x49   : > { %316 = vmatprep.mubr.f32.mxu0 %v1507_v0  ;;  %383 = vperm.xlu0 %1363, %v1203_v22  }
  0x4a   : > { %388 = vperm.xlu1 %1364, %v1204_v23  }
  0x4c   : > { %1195 = vmatmul.mubr.msk.f32.gmra.mrb[4].mxu0 %vm227_vm0, %v201_v24 }
  0x4d   : > { %322 = vmatprep.mubr.f32.mxu0 %v1507_v0  ;;  %512 = vperm.xlu0 %1363, %v1213_v25  }
  0x4e   : > { %517 = vperm.xlu1 %1364, %v1214_v26  }
  0x50   : > { %1196 = vmatmul.mubr.msk.f32.gmra.mrb[6].mxu0 %vm227_vm0, %v202_v27 }
  0x51   : > { %606 = vmatprep.mubr.f32.mxu0 %v1507_v0  ;;  %522 = vperm.xlu0 %1363, %v1215_v28  }
  0x52   : > { %527 = vperm.xlu1 %1364, %v1216_v29  }
  0x55   : > { %651 = vperm.xlu0 %1363, %v1225_v30  }
  0x56   : > { %656 = vperm.xlu1 %1364, %v1226_v31  }
  0x59   : > { %661 = vperm.xlu0 %1363, %v1227_v32  }
  0x5a   : > { %666 = vperm.xlu1 %1364, %v1228_v33  }
  0x5d   : > { %814 = vperm.xlu0 %1363, %v1237_v34  }
  0x5e   : > { %819 = vperm.xlu1 %1364, %v1238_v35  }
  0x61   : > { %824 = vperm.xlu0 %1363, %v1239_v36  }
  0x62   : > { %829 = vperm.xlu1 %1364, %v1240_v37  }
  0x65   : > { %953 = vperm.xlu0 %1363, %v1249_v38  }
  0xbc   : > { %v210_v39 = vpop.permute.xlu0 %209 }
  0xbd   : > { %v220_v48 = vpop.permute.xlu1 %219 }
  0xc0   : > { %v215_v44 = vpop.permute.xlu0 %214 }
  0xc1   : > { %v225_v1 = vpop.permute.xlu1 %224 }
  0xc4   : > { %v374_v20 = vpop.permute.xlu0 %373 }
  0xc5   : > { %v379_v25 = vpop.permute.xlu1 %378 }
  0xc8   : > { %v384_v30 = vpop.permute.xlu0 %383 }
  0xc9   : > { %v389_v35 = vpop.permute.xlu1 %388 }
 0x117   : > { %v306_v40 = vpop.f32.mrb[0].mxu0 }
 0x118   : > { %v307_v41 = vadd.f32 %v306_v40, %v210_v39  ;;  %v308_v42 = vpop.f32.mrb[1].mxu0 }
 0x119   : > { %v309_v43 = vadd.f32 %v308_v42, %v210_v39 }
 0x11a   : > { %vm337_vm1 = vcmp.lt.f32.partialorder %v307_v41, -0.79467595  ;;  %vm329_vm3 = vcmp.gt.f32.partialorder %v307_v41, 0.79467595 }
 0x11b   : > { %vm338_vm2 = vcmp.lt.f32.partialorder %v309_v43, -0.79467595  ;;  %v312_v45 = vpop.f32.mrb[2].mxu0  ;;  %vm330_vm4 = vcmp.gt.f32.partialorder %v309_v43, 0.79467595  ;;  %v345_v50 = vsel %vm337_vm1, -1.0, %v1507_v0 }
 0x11c   : > { %v313_v46 = vadd.f32 %v312_v45, %v215_v44  ;;  %v314_v47 = vpop.f32.mrb[3].mxu0  ;;  %v346_v51 = vsel %vm338_vm2, -1.0, %v1507_v0  ;;  %v353_v57 = vsel %vm329_vm3, 1.0, %v345_v50 }
 0x11d   : > { %v315_v49 = vadd.f32 %v314_v47, %v215_v44  ;;  %v354_v60 = vsel %vm330_vm4, 1.0, %v346_v51 }
 0x11e   : > { %vm331_vm5 = vcmp.gt.f32.partialorder %v313_v46, 0.79467595  ;;  %vm339_vm6 = vcmp.lt.f32.partialorder %v313_v46, -0.79467595 }
 0x11f   : > { %vm340_vm7 = vcmp.lt.f32.partialorder %v315_v49, -0.79467595  ;;  %v318_v52 = vpop.f32.mrb[4].mxu0  ;;  %vm332_vm8 = vcmp.gt.f32.partialorder %v315_v49, 0.79467595  ;;  %v347_v53 = vsel %vm339_vm6, -1.0, %v1507_v0 }
 0x120   : > { %v319_v54 = vadd.f32 %v318_v52, %v220_v48  ;;  %v320_v55 = vpop.f32.mrb[5].mxu0  ;;  %v348_v56 = vsel %vm340_vm7, -1.0, %v1507_v0  ;;  %v355_v58 = vsel %vm331_vm5, 1.0, %v347_v53  ;;  %v1209_v52 = vld [vmem:[%s1892_s0 + $0x40] sm:$0xff]  ;;  %v1210_v53 = vld [vmem:[%s1892_s0 + $0x48] sm:$0xff] }
 0x121   : > { %v321_v59 = vadd.f32 %v320_v55, %v220_v48  ;;  %v356_v61 = vsel %vm332_vm8, 1.0, %v348_v56  ;;  %v1274_v62 = vpack.c.bf16 %v355_v58, %v353_v57  ;;  %v1212_v55 = vld [vmem:[%s1892_s0 + $0x58] sm:$0xff]  ;;  %v513_v58 = vpop.permute.xlu0 %512 }
 0x122   : > { %vm341_vm9 = vcmp.lt.f32.partialorder %v319_v54, -0.79467595  ;;  %v1272_v63 = vpack.c.bf16 %v356_v61, %v354_v60  ;;  %vm333_vm11 = vcmp.gt.f32.partialorder %v319_v54, 0.79467595  ;;  %v1211_v54 = vld [vmem:[%s1892_s0 + $0x50] sm:$0xff]  ;;  %v518_v60 = vpop.permute.xlu1 %517 }
 0x123   : > { %vm342_vm10 = vcmp.lt.f32.partialorder %v321_v59, -0.79467595  ;;  %v324_v2 = vpop.f32.mrb[6].mxu0  ;;  %v349_v5 = vsel %vm341_vm9, -1.0, %v1507_v0  ;;  %vm334_vm12 = vcmp.gt.f32.partialorder %v321_v59, 0.79467595 }
 0x124   : > { %v325_v3 = vadd.f32 %v324_v2, %v225_v1  ;;  %v326_v4 = vpop.f32.mrb[7].mxu0  ;;  %1273 = vmatprep.subr.bf16.mxu1 %v1272_v63  ;;  %v350_v7 = vsel %vm342_vm10, -1.0, %v1507_v0  ;;  %v357_v9 = vsel %vm333_vm11, 1.0, %v349_v5 }
 0x125   : > { %v327_v6 = vadd.f32 %v326_v4, %v225_v1  ;;  %1275 = vmatpush1.bf16.msra.mxu1 %v1274_v62  ;;  %v358_v12 = vsel %vm334_vm12, 1.0, %v350_v7 }
 0x126   : > { %vm335_vm13 = vcmp.gt.f32.partialorder %v325_v3, 0.79467595  ;;  %vm343_vm14 = vcmp.lt.f32.partialorder %v325_v3, -0.79467595 }
 0x127   : > { %v351_v8 = vsel %vm343_vm14, -1.0, %v1507_v0  ;;  %vm336_vm15 = vcmp.gt.f32.partialorder %v327_v6, 0.79467595  ;;  %vm344_vm1 = vcmp.lt.f32.partialorder %v327_v6, -0.79467595 }
 0x128   : > { %v359_v10 = vsel %vm335_vm13, 1.0, %v351_v8  ;;  %v352_v11 = vsel %vm344_vm1, -1.0, %v1507_v0 }
 0x129   : > { %v360_v13 = vsel %vm336_vm15, 1.0, %v352_v11  ;;  %v1278_v14 = vpack.c.bf16 %v359_v10, %v357_v9  ;;  %v523_v10 = vpop.permute.xlu0 %522 }
 0x12a   : > { %v1276_v15 = vpack.c.bf16 %v360_v13, %v358_v12  ;;  %v528_v13 = vpop.permute.xlu1 %527 }
 0x12c   : > { %1277 = vmatprep.subr.bf16.mxu1 %v1276_v15 }
 0x12d   : > { %1279 = vmatpush1.bf16.msra.mxu1 %v1278_v14 }
 0x130   : > { %1205 = vmatmul.mubr.msk.f32.vlgmr.msra.gmra.mrb[0].mxu1 %vm227_vm0, %v1197_v16 }
 0x131   : > { %473 = vmatprep.mubr.f32.mxu1 %v1507_v0 }
 0x134   : > { %1206 = vmatmul.mubr.msk.f32.gmra.mrb[2].mxu1 %vm227_vm0, %v1198_v17 }
 0x135   : > { %479 = vmatprep.mubr.f32.mxu1 %v1507_v0 }
 0x138   : > { %1207 = vmatmul.mubr.msk.f32.gmra.mrb[4].mxu1 %vm227_vm0, %v1199_v18 }
 0x139   : > { %485 = vmatprep.mubr.f32.mxu1 %v1507_v0 }
 0x13c   : > { %1208 = vmatmul.mubr.msk.f32.gmra.mrb[6].mxu1 %vm227_vm0, %v1200_v19 }
 0x13d   : > { %745 = vmatprep.mubr.f32.mxu1 %v1507_v0 }
 0x203   : > { %v469_v21 = vpop.f32.mrb[0].mxu1 }
 0x204   : > { %v470_v22 = vadd.f32 %v469_v21, %v374_v20  ;;  %v471_v23 = vpop.f32.mrb[1].mxu1 }
 0x205   : > { %v472_v24 = vadd.f32 %v471_v23, %v374_v20 }
 0x206   : > { %1365 = vtanh.f32 %v470_v22 }
 0x207   : > { %v475_v26 = vpop.f32.mrb[2].mxu1  ;;  %1367 = vtanh.f32 %v472_v24 }
 0x208   : > { %v476_v27 = vadd.f32 %v475_v26, %v379_v25  ;;  %v477_v28 = vpop.f32.mrb[3].mxu1  ;;  %v1222_v26 = vld [vmem:[%s1892_s0 + $0x68] sm:$0xff] }
 0x209   : > { %v478_v29 = vadd.f32 %v477_v28, %v379_v25  ;;  %v1221_v25 = vld [vmem:[%s1892_s0 + $0x60] sm:$0xff]  ;;  %v1224_v28 = vld [vmem:[%s1892_s0 + $0x78] sm:$0xff] }
 0x20a   : > { %1369 = vtanh.f32 %v476_v27  ;;  %v1223_v27 = vld [vmem:[%s1892_s0 + $0x70] sm:$0xff] }
 0x20b   : > { %1371 = vtanh.f32 %v478_v29  ;;  %v481_v31 = vpop.f32.mrb[4].mxu1  ;;  %v652_v29 = vpop.permute.xlu0 %651 }
 0x20c   : > { %v482_v32 = vadd.f32 %v481_v31, %v384_v30  ;;  %v483_v33 = vpop.f32.mrb[5].mxu1 }
 0x20d   : > { %v484_v34 = vadd.f32 %v483_v33, %v384_v30 }
 0x20e   : > { %1373 = vtanh.f32 %v482_v32 }
 0x20f   : > { %v487_v36 = vpop.f32.mrb[6].mxu1  ;;  %1375 = vtanh.f32 %v484_v34  ;;  %v657_v34 = vpop.permute.xlu1 %656 }
 0x210   : > { %v488_v37 = vadd.f32 %v487_v36, %v389_v35  ;;  %v489_v38 = vpop.f32.mrb[7].mxu1  ;;  %v1366_v40 = vpop.eup %1365 }
 0x211   : > { %v490_v39 = vadd.f32 %v489_v38, %v389_v35  ;;  %v1368_v41 = vpop.eup %1367 }
 0x212   : > { %1377 = vtanh.f32 %v488_v37 }
 0x213   : > { %1379 = vtanh.f32 %v490_v39 }
 0x214   : > { %v1370_v42 = vpop.eup %1369 }
 0x215   : > { %v1372_v43 = vpop.eup %1371  ;;  %v1282_v44 = vpack.c.bf16 %v1370_v42, %v1366_v40 }
 0x216   : > { %v1280_v45 = vpack.c.bf16 %v1372_v43, %v1368_v41  ;;  %v662_v41 = vpop.permute.xlu0 %661 }
 0x218   : > { %1281 = vmatprep.subr.bf16.mxu0 %v1280_v45  ;;  %v1374_v46 = vpop.eup %1373 }
 0x219   : > { %1283 = vmatpush1.bf16.msra.mxu0 %v1282_v44  ;;  %v1376_v47 = vpop.eup %1375 }
 0x21c   : > { %v1378_v48 = vpop.eup %1377 }
 0x21d   : > { %v1380_v49 = vpop.eup %1379  ;;  %v1286_v50 = vpack.c.bf16 %v1378_v48, %v1374_v46 }
 0x21e   : > { %v1284_v51 = vpack.c.bf16 %v1380_v49, %v1376_v47 }
 0x220   : > { %1285 = vmatprep.subr.bf16.mxu0 %v1284_v51 }
 0x221   : > { %1287 = vmatpush1.bf16.msra.mxu0 %v1286_v50 }
 0x224   : > { %1217 = vmatmul.mubr.msk.f32.vlgmr.msra.gmra.mrb[8].mxu0 %vm227_vm0, %v1209_v52 }
 0x225   : > { %612 = vmatprep.mubr.f32.mxu0 %v1507_v0 }
 0x228   : > { %1218 = vmatmul.mubr.msk.f32.gmra.mrb[10].mxu0 %vm227_vm0, %v1210_v53 }
 0x229   : > { %618 = vmatprep.mubr.f32.mxu0 %v1507_v0 }
 0x22c   : > { %1219 = vmatmul.mubr.msk.f32.gmra.mrb[12].mxu0 %vm227_vm0, %v1211_v54  ;;  %v667_v54 = vpop.permute.xlu1 %666 }
 0x22d   : > { %624 = vmatprep.mubr.f32.mxu0 %v1507_v0 }
 0x230   : > { %1220 = vmatmul.mubr.msk.f32.gmra.mrb[14].mxu0 %vm227_vm0, %v1212_v55 }
 0x231   : > { %908 = vmatprep.mubr.f32.mxu0 %v1507_v0 }
 0x2f7   : > { %v608_v56 = vpop.f32.mrb[8].mxu0 }
 0x2f8   : > { %v610_v57 = vpop.f32.mrb[9].mxu0  ;;  %v609_v59 = vadd.f32 %v608_v56, %v513_v58 }
 0x2f9   : > { %v611_v61 = vadd.f32 %v610_v57, %v513_v58 }
 0x2fa   : > { %v631_v3 = vmax.f32 %v609_v59, 0.0 }
 0x2fb   : > { %v614_v62 = vpop.f32.mrb[10].mxu0  ;;  %v632_v5 = vmax.f32 %v611_v61, 0.0 }
 0x2fc   : > { %v615_v63 = vadd.f32 %v614_v62, %v518_v60  ;;  %v616_v1 = vpop.f32.mrb[11].mxu0 }
 0x2fd   : > { %v617_v2 = vadd.f32 %v616_v1, %v518_v60 }
 0x2fe   : > { %v633_v4 = vmax.f32 %v615_v63, 0.0 }
 0x2ff   : > { %v634_v6 = vmax.f32 %v617_v2, 0.0  ;;  %v620_v7 = vpop.f32.mrb[12].mxu0 }
 0x300   : > { %v1290_v8 = vpack.c.bf16 %v633_v4, %v631_v3  ;;  %v622_v9 = vpop.f32.mrb[13].mxu0  ;;  %v621_v12 = vadd.f32 %v620_v7, %v523_v10  ;;  %v1234_v7 = vld [vmem:[%s1892_s0 + $0x88] sm:$0xff] }
 0x301   : > { %v1288_v11 = vpack.c.bf16 %v634_v6, %v632_v5  ;;  %v623_v14 = vadd.f32 %v622_v9, %v523_v10  ;;  %v1233_v6 = vld [vmem:[%s1892_s0 + $0x80] sm:$0xff]  ;;  %v1236_v9 = vld [vmem:[%s1892_s0 + $0x98] sm:$0xff]  ;;  %v815_v10 = vpop.permute.xlu0 %814 }
 0x302   : > { %v635_v19 = vmax.f32 %v621_v12, 0.0 }
 0x303   : > { %v626_v15 = vpop.f32.mrb[14].mxu0  ;;  %1289 = vmatprep.subr.bf16.mxu1 %v1288_v11  ;;  %v636_v21 = vmax.f32 %v623_v14, 0.0 }
 0x304   : > { %v627_v16 = vadd.f32 %v626_v15, %v528_v13  ;;  %v628_v17 = vpop.f32.mrb[15].mxu0  ;;  %1291 = vmatpush1.bf16.msra.mxu1 %v1290_v8  ;;  %v1235_v8 = vld [vmem:[%s1892_s0 + $0x90] sm:$0xff]  ;;  %v820_v15 = vpop.permute.xlu1 %819 }
 0x305   : > { %v629_v18 = vadd.f32 %v628_v17, %v528_v13 }
 0x306   : > { %v637_v20 = vmax.f32 %v627_v16, 0.0 }
 0x307   : > { %v638_v22 = vmax.f32 %v629_v18, 0.0 }
 0x308   : > { %v1294_v23 = vpack.c.bf16 %v637_v20, %v635_v19  ;;  %v825_v20 = vpop.permute.xlu0 %824 }
 0x309   : > { %v1292_v24 = vpack.c.bf16 %v638_v22, %v636_v21 }
 0x30b   : > { %1293 = vmatprep.subr.bf16.mxu1 %v1292_v24 }
 0x30c   : > { %1295 = vmatpush1.bf16.msra.mxu1 %v1294_v23 }
 0x30f   : > { %1229 = vmatmul.mubr.msk.f32.vlgmr.msra.gmra.mrb[8].mxu1 %vm227_vm0, %v1221_v25  ;;  %v830_v25 = vpop.permute.xlu1 %829 }
 0x310   : > { %751 = vmatprep.mubr.f32.mxu1 %v1507_v0 }
 0x313   : > { %1230 = vmatmul.mubr.msk.f32.gmra.mrb[10].mxu1 %vm227_vm0, %v1222_v26 }
 0x314   : > { %757 = vmatprep.mubr.f32.mxu1 %v1507_v0 }
 0x317   : > { %1231 = vmatmul.mubr.msk.f32.gmra.mrb[12].mxu1 %vm227_vm0, %v1223_v27 }
 0x318   : > { %763 = vmatprep.mubr.f32.mxu1 %v1507_v0 }
 0x31b   : > { %1232 = vmatmul.mubr.msk.f32.gmra.mrb[14].mxu1 %vm227_vm0, %v1224_v28 }
 0x31c   : > { %1044 = vmatprep.mubr.f32.mxu1 %v1507_v0 }
 0x3e2   : > { %v747_v30 = vpop.f32.mrb[8].mxu1 }
 0x3e3   : > { %v748_v31 = vadd.f32 %v747_v30, %v652_v29  ;;  %v749_v32 = vpop.f32.mrb[9].mxu1 }
 0x3e4   : > { %v750_v33 = vadd.f32 %v749_v32, %v652_v29 }
 0x3e5   : > { %vm778_vm2 = vcmp.lt.f32.partialorder %v748_v31, -0.79467595  ;;  %vm770_vm4 = vcmp.gt.f32.partialorder %v748_v31, 0.79467595 }
 0x3e6   : > { %vm779_vm3 = vcmp.lt.f32.partialorder %v750_v33, -0.79467595  ;;  %v753_v35 = vpop.f32.mrb[10].mxu1  ;;  %v786_v38 = vsel %vm778_vm2, -1.0, %v1507_v0  ;;  %vm771_vm5 = vcmp.gt.f32.partialorder %v750_v33, 0.79467595 }
 0x3e7   : > { %v754_v36 = vadd.f32 %v753_v35, %v657_v34  ;;  %v755_v37 = vpop.f32.mrb[11].mxu1  ;;  %v787_v40 = vsel %vm779_vm3, -1.0, %v1507_v0  ;;  %v794_v44 = vsel %vm770_vm4, 1.0, %v786_v38 }
 0x3e8   : > { %v756_v39 = vadd.f32 %v755_v37, %v657_v34  ;;  %v795_v49 = vsel %vm771_vm5, 1.0, %v787_v40 }
 0x3e9   : > { %vm772_vm6 = vcmp.gt.f32.partialorder %v754_v36, 0.79467595  ;;  %vm780_vm7 = vcmp.lt.f32.partialorder %v754_v36, -0.79467595 }
 0x3ea   : > { %v788_v42 = vsel %vm780_vm7, -1.0, %v1507_v0  ;;  %vm773_vm8 = vcmp.gt.f32.partialorder %v756_v39, 0.79467595  ;;  %vm781_vm9 = vcmp.lt.f32.partialorder %v756_v39, -0.79467595  ;;  %v759_v43 = vpop.f32.mrb[12].mxu1 }
 0x3eb   : > { %v796_v45 = vsel %vm772_vm6, 1.0, %v788_v42  ;;  %v789_v46 = vsel %vm781_vm9, -1.0, %v1507_v0  ;;  %v760_v47 = vadd.f32 %v759_v43, %v662_v41  ;;  %v761_v48 = vpop.f32.mrb[13].mxu1  ;;  %v1245_v42 = vld [vmem:[%s1892_s0 + $0xa0] sm:$0xff]  ;;  %v1246_v43 = vld [vmem:[%s1892_s0 + $0xa8] sm:$0xff] }
 0x3ec   : > { %v1298_v50 = vpack.c.bf16 %v796_v45, %v794_v44  ;;  %v797_v51 = vsel %vm773_vm8, 1.0, %v789_v46  ;;  %v762_v52 = vadd.f32 %v761_v48, %v662_v41  ;;  %v1247_v44 = vld [vmem:[%s1892_s0 + $0xb0] sm:$0xff]  ;;  %v1248_v45 = vld [vmem:[%s1892_s0 + $0xb8] sm:$0xff]  ;;  %v954_v46 = vpop.permute.xlu0 %953 }
 0x3ed   : > { %vm782_vm10 = vcmp.lt.f32.partialorder %v760_v47, -0.79467595  ;;  %v1296_v53 = vpack.c.bf16 %v797_v51, %v795_v49  ;;  %vm774_vm12 = vcmp.gt.f32.partialorder %v760_v47, 0.79467595 }
 0x3ee   : > { %vm783_vm11 = vcmp.lt.f32.partialorder %v762_v52, -0.79467595  ;;  %v765_v55 = vpop.f32.mrb[14].mxu1  ;;  %v790_v58 = vsel %vm782_vm10, -1.0, %v1507_v0  ;;  %vm775_vm13 = vcmp.gt.f32.partialorder %v762_v52, 0.79467595 }
 0x3ef   : > { %v766_v56 = vadd.f32 %v765_v55, %v667_v54  ;;  %v767_v57 = vpop.f32.mrb[15].mxu1  ;;  %1297 = vmatprep.subr.bf16.mxu0 %v1296_v53  ;;  %v791_v60 = vsel %vm783_vm11, -1.0, %v1507_v0  ;;  %v798_v62 = vsel %vm774_vm12, 1.0, %v790_v58 }
 0x3f0   : > { %v768_v59 = vadd.f32 %v767_v57, %v667_v54  ;;  %1299 = vmatpush1.bf16.msra.mxu0 %v1298_v50  ;;  %v799_v2 = vsel %vm775_vm13, 1.0, %v791_v60 }
 0x3f1   : > { %vm776_vm14 = vcmp.gt.f32.partialorder %v766_v56, 0.79467595  ;;  %vm784_vm15 = vcmp.lt.f32.partialorder %v766_v56, -0.79467595 }
 0x3f2   : > { %v792_v61 = vsel %vm784_vm15, -1.0, %v1507_v0  ;;  %vm777_vm1 = vcmp.gt.f32.partialorder %v768_v59, 0.79467595  ;;  %vm785_vm2 = vcmp.lt.f32.partialorder %v768_v59, -0.79467595 }
 0x3f3   : > { %v800_v63 = vsel %vm776_vm14, 1.0, %v792_v61  ;;  %v793_v1 = vsel %vm785_vm2, -1.0, %v1507_v0 }
 0x3f4   : > { %v1302_v3 = vpack.c.bf16 %v800_v63, %v798_v62  ;;  %v801_v4 = vsel %vm777_vm1, 1.0, %v793_v1 }
 0x3f5   : > { %v1300_v5 = vpack.c.bf16 %v801_v4, %v799_v2 }
 0x3f7   : > { %1301 = vmatprep.subr.bf16.mxu0 %v1300_v5 }
 0x3f8   : > { %1303 = vmatpush1.bf16.msra.mxu0 %v1302_v3 }
 0x3fb   : > { %1241 = vmatmul.mubr.msk.f32.vlgmr.msra.gmra.mrb[16].mxu0 %vm227_vm0, %v1233_v6 }
 0x3fc   : > { %914 = vmatprep.mubr.f32.mxu0 %v1507_v0 }
 0x3ff   : > { %1242 = vmatmul.mubr.msk.f32.gmra.mrb[18].mxu0 %vm227_vm0, %v1234_v7 }
 0x400   : > { %920 = vmatprep.mubr.f32.mxu0 %v1507_v0 }
 0x403   : > { %1243 = vmatmul.mubr.msk.f32.gmra.mrb[20].mxu0 %vm227_vm0, %v1235_v8 }
 0x404   : > { %926 = vmatprep.mubr.f32.mxu0 %v1507_v0 }
 0x407   : > { %1244 = vmatmul.mubr.msk.f32.gmra.mrb[22].mxu0 %vm227_vm0, %v1236_v9 }
 0x4ce   : > { %v910_v11 = vpop.f32.mrb[16].mxu0 }
 0x4cf   : > { %v911_v12 = vadd.f32 %v910_v11, %v815_v10  ;;  %v912_v13 = vpop.f32.mrb[17].mxu0 }
 0x4d0   : > { %v913_v14 = vadd.f32 %v912_v13, %v815_v10 }
 0x4d1   : > { %1381 = vtanh.f32 %v911_v12 }
 0x4d2   : > { %v916_v16 = vpop.f32.mrb[18].mxu0  ;;  %1383 = vtanh.f32 %v913_v14 }
 0x4d3   : > { %v917_v17 = vadd.f32 %v916_v16, %v820_v15  ;;  %v918_v18 = vpop.f32.mrb[19].mxu0 }
 0x4d4   : > { %v919_v19 = vadd.f32 %v918_v18, %v820_v15 }
 0x4d5   : > { %1385 = vtanh.f32 %v917_v17 }
 0x4d6   : > { %1387 = vtanh.f32 %v919_v19  ;;  %v922_v21 = vpop.f32.mrb[20].mxu0 }
 0x4d7   : > { %v923_v22 = vadd.f32 %v922_v21, %v825_v20  ;;  %v924_v23 = vpop.f32.mrb[21].mxu0 }
 0x4d8   : > { %v925_v24 = vadd.f32 %v924_v23, %v825_v20 }
 0x4d9   : > { %1389 = vtanh.f32 %v923_v22 }
 0x4da   : > { %v928_v26 = vpop.f32.mrb[22].mxu0  ;;  %1391 = vtanh.f32 %v925_v24 }
 0x4db   : > { %v929_v27 = vadd.f32 %v928_v26, %v830_v25  ;;  %v930_v28 = vpop.f32.mrb[23].mxu0  ;;  %v1382_v30 = vpop.eup %1381 }
 0x4dc   : > { %v931_v29 = vadd.f32 %v930_v28, %v830_v25  ;;  %v1384_v31 = vpop.eup %1383 }
 0x4dd   : > { %1393 = vtanh.f32 %v929_v27 }
 0x4de   : > { %1395 = vtanh.f32 %v931_v29 }
 0x4df   : > { %v1386_v32 = vpop.eup %1385 }
 0x4e0   : > { %v1388_v33 = vpop.eup %1387  ;;  %v1306_v34 = vpack.c.bf16 %v1386_v32, %v1382_v30 }
 0x4e1   : > { %v1304_v35 = vpack.c.bf16 %v1388_v33, %v1384_v31 }
 0x4e3   : > { %1305 = vmatprep.subr.bf16.mxu1 %v1304_v35  ;;  %v1390_v36 = vpop.eup %1389 }
 0x4e4   : > { %1307 = vmatpush1.bf16.msra.mxu1 %v1306_v34  ;;  %v1392_v37 = vpop.eup %1391 }
 0x4e7   : > { %v1394_v38 = vpop.eup %1393 }
 0x4e8   : > { %v1396_v39 = vpop.eup %1395  ;;  %v1310_v40 = vpack.c.bf16 %v1394_v38, %v1390_v36 }
 0x4e9   : > { %v1308_v41 = vpack.c.bf16 %v1396_v39, %v1392_v37 }
 0x4eb   : > { %1309 = vmatprep.subr.bf16.mxu1 %v1308_v41 }
 0x4ec   : > { %1311 = vmatpush1.bf16.msra.mxu1 %v1310_v40 }
 0x4ef   : > { %1253 = vmatmul.mubr.msk.f32.vlgmr.msra.gmra.mrb[16].mxu1 %vm227_vm0, %v1245_v42 }
 0x4f0   : > { %1050 = vmatprep.mubr.f32.mxu1 %v1507_v0 }
 0x4f3   : > { %1254 = vmatmul.mubr.msk.f32.gmra.mrb[18].mxu1 %vm227_vm0, %v1246_v43 }
 0x4f4   : > { %1054 = vmatprep.mubr.f32.mxu1 %v1507_v0 }
 0x4f7   : > { %1255 = vmatmul.mubr.msk.f32.gmra.mrb[20].mxu1 %vm227_vm0, %v1247_v44 }
 0x4f8   : > { %1058 = vmatprep.mubr.f32.mxu1 %v1507_v0 }
 0x4fb   : > { %1256 = vmatmul.mubr.msk.f32.gmra.mrb[22].mxu1 %vm227_vm0, %v1248_v45 }
 0x5c2   : > { %v1046_v47 = vpop.f32.mrb[16].mxu1 }
 0x5c3   : > { %v1047_v48 = vadd.f32 %v1046_v47, %v954_v46  ;;  %v1048_v49 = vpop.f32.mrb[17].mxu1 }
 0x5c4   : > { %v1049_v50 = vadd.f32 %v1048_v49, %v954_v46 }
 0x5c5   : > { %v1063_v51 = vrot.slane %v1047_v48, 4 }
 0x5c6   : > { %v1069_v52 = vrot.slane %v1049_v50, 4  ;;  %v1052_v53 = vpop.f32.mrb[18].mxu1 }
 0x5c7   : > { %v1064_v54 = vmax.f32 %v1047_v48, %v1063_v51  ;;  %v1053_v55 = vpop.f32.mrb[19].mxu1 }
 0x5c8   : > { %v1070_v56 = vmax.f32 %v1049_v50, %v1069_v52 }
 0x5c9   : > { %v1065_v57 = vrot.slane %v1064_v54, 2 }
 0x5ca   : > { %v1071_v58 = vrot.slane %v1070_v56, 2  ;;  %v1056_v0 = vpop.f32.mrb[20].mxu1 }
 0x5cb   : > { %v1066_v59 = vmax.f32 %v1064_v54, %v1065_v57  ;;  %v1057_v60 = vpop.f32.mrb[21].mxu1 }
 0x5cc   : > { %v1072_v61 = vmax.f32 %v1070_v56, %v1071_v58 }
 0x5cd   : > { %v1067_v62 = vrot.slane %v1066_v59, 1 }
 0x5ce   : > { %v1073_v63 = vrot.slane %v1072_v61, 1  ;;  %v1060_v1 = vpop.f32.mrb[22].mxu1 }
 0x5cf   : > { %v1068_v2 = vmax.f32 %v1066_v59, %v1067_v62  ;;  %v1061_v3 = vpop.f32.mrb[23].mxu1 }
 0x5d0   : > { %v1074_v4 = vmax.f32 %v1072_v61, %v1073_v63 }
 0x5d1   : > { %v1075_v5 = vsub.f32 %v1047_v48, %v1068_v2 }
 0x5d2   : > { %v1076_v6 = vsub.f32 %v1049_v50, %v1074_v4 }
 0x5d3   : > { %v1077_v7 = vmul.f32 1.442695, %v1075_v5 }
 0x5d4   : > { %v1079_v8 = vmul.f32 1.442695, %v1076_v6 }
 0x5d5   : > { %1397 = vpow2.f32 %v1077_v7 }
 0x5d6   : > { %1399 = vpow2.f32 %v1079_v8 }
 0x5df   : > { %v1398_v9 = vpop.eup %1397 }
 0x5e0   : > { %v1400_v10 = vpop.eup %1399  ;;  %v1081_v11 = vrot.slane %v1398_v9, 4 }
 0x5e1   : > { %v1087_v12 = vrot.slane %v1400_v10, 4 }
 0x5e2   : > { %v1082_v13 = vadd.f32 %v1398_v9, %v1081_v11 }
 0x5e3   : > { %v1088_v14 = vadd.f32 %v1400_v10, %v1087_v12 }
 0x5e4   : > { %v1083_v15 = vrot.slane %v1082_v13, 2 }
 0x5e5   : > { %v1089_v16 = vrot.slane %v1088_v14, 2 }
 0x5e6   : > { %v1084_v17 = vadd.f32 %v1083_v15, %v1082_v13 }
 0x5e7   : > { %v1090_v18 = vadd.f32 %v1089_v16, %v1088_v14 }
 0x5e8   : > { %v1085_v19 = vrot.slane %v1084_v17, 1 }
 0x5e9   : > { %v1091_v20 = vrot.slane %v1090_v18, 1 }
 0x5ea   : > { %v1086_v21 = vadd.f32 %v1085_v19, %v1084_v17 }
 0x5eb   : > { %v1092_v22 = vadd.f32 %v1091_v20, %v1090_v18 }
 0x5ec   : > { %1401 = vrcp.f32 %v1086_v21 }
 0x5ed   : > { %1403 = vrcp.f32 %v1092_v22 }
 0x5f6   : > { %v1402_v23 = vpop.eup %1401 }
 0x5f7   : > { %v1404_v24 = vpop.eup %1403  ;;  %v1095_v25 = vmul.f32 %v1402_v23, %v1398_v9 }
 0x5f8   : > { %v1096_v26 = vmul.f32 %v1404_v24, %v1400_v10 }
 0x5f9   : > { %1097 = vst [vmem:[%s188_s22] sm:$0xff] %v1095_v25 }
 0x5fa   : > { %1098 = vst [vmem:[%s188_s22 + $0x8] sm:$0xff] %v1096_v26 }
 0x5fb   : > { %1448 = shalt.err (!%p1445_p3)
}
 0x5fc   : > { %s1449_s9 = scalar_lea.hbm %s1848_s29, 256  ;;  %s1453_s4 = scalar_lea.hbm %s1895_s3, 512 }
 0x5fd   : > { %p1450_p5 = scmp.ne.s32.totalorder %s1848_s29, %s1449_s9  ;;  %p1454_p9 = scmp.lt.u32.totalorder %s1848_s29, %s1895_s3 }
 0x5fe   : > { %p1455_p0 = scmp.lt.u32.totalorder %s1453_s4, %s1449_s9  ;;  %p1457_p6 = scmp.lt.u32.totalorder %s1449_s9, %s1848_s29 }
 0x5ff   : > { %p1451_p7 = pnand %p1450_p5, %p1903_p11 }
 0x600   : > { %p1456_p2 = por %p1455_p0, %p1454_p9 }
 0x601   : > { %p1452_p8 = pneg %p1451_p7 }
 0x602   : > { %p1458_p12 = por %p1457_p6, %p1456_p2 }
 0x604   : > { %p1459_p13 = pnand %p1458_p12, %p1452_p8 }
 0x606   : > { %1462 = shalt.err (!%p1459_p13)
}
 0x607   : > { %1314 = dma.vmem_to_hbm [thread:$0]  (%p1903_p11), %s1850_s26, 256, %s1848_s29, %s1100_s30  }
 0x608 PF: > { %s1126_s8 = sand.u32 1, %s1489_s12   ;;  %p1904_p4 = scmp.ne.s32.totalorder %s1900_s25, 0 }
 0x609   : > { %p1905_p10 = scmp.ge.s32.totalorder %s1501_s15, 2  ;;  %s1127_s19 = scalar_lea.sflag [#allocation4], %s1126_s8 }
 0x60b   : > { %p1321_p1 = pnand %p1905_p10, %p1904_p4 }
 0x60d   : > { %1484 = dma.done.wait (!%p1321_p1), %s1127_s19, 256  }
 0x60e   : > { %1486 = vsyncadd (!%p1321_p1), %s1127_s19, 4294967040  ;;  %p16_p3 = scmp.ge.s32.totalorder %s1555_s18, 4   ;;  %s1906_s12 = smov %s1493_s13 }
 0x60f   : > { %s1907_s13 = smov %s1497_s14  ;;  %s1908_s14 = smov %s1567_s21 }
 0x610   : > { %s1909_s15 = smov %s1555_s18  ;;  %18 = sbr.rel (!%p16_p3) target bundleno = 5 (0x5), region = 87 }
 0x617   :  { %1132 = vsyncpa [#allocation3], 1 }
 0x618   :  { %1134 = vsyncpa [#allocation3 + $0x1], 1 }
 0x619   :  { %1135 = vsyncpa [#allocation4], 1 }
 0x61a   :  { %1137 = vsyncpa [#allocation4 + $0x1], 1 }

</bundles_post_ra>
